<compile_context>
chip_gen: v6e
topology: v6e:2x2x1
jax: 0.10.0
libtpu: 0.0.40
codegen_flags: <defaults>
</compile_context>

<pallas_src>
import jax
import jax.numpy as jnp
from jax.experimental import pallas as pl
from jax.experimental.pallas import tpu as pltpu

IN_FEATURES = 1024
OUT_FEATURES = 8

MAX_TILE_B_BF16 = 2048   # 2048*1024*2B = 4 MiB per x buffer
MAX_TILE_B_F32 = 1024    # 1024*1024*4B = 4 MiB per x buffer
MIN_TILE_B = 128
TARGET_GRID_STEPS = 4    # give the v7x megacore something to split


def _cdiv(a, b):
    return (a + b - 1) // b


def _round_up(n, m):
    return ((n + m - 1) // m) * m


def _linear_kernel(x_ref, wt_ref, b_ref, o_ref):
    # x_ref:  [TB, 1024]  (compute dtype, streamed per grid step)
    # wt_ref: [1024, 8]   (compute dtype, constant index_map -> VMEM resident)
    # b_ref:  [1, 8]      (f32, resident)
    # o_ref:  [TB, 8]     (output dtype, f32 by default)
    acc = jnp.dot(x_ref[...], wt_ref[...], preferred_element_type=jnp.float32)
    o_ref[...] = (acc + b_ref[...]).astype(o_ref.dtype)


def emo_classifier_1024_forward(x, weight, bias, *, compute_dtype=jnp.bfloat16):
    """x: [B, 1024], weight: [8, 1024], bias: [8] -> [B, 8]  (y = x @ W.T + b).

    compute_dtype controls the MXU input precision (accumulation is always
    f32). Pass jnp.float32 to match nn.Linear bit-for-bit (within MXU f32);
    bf16 halves HBM read traffic of x. NOTE: ideally the caller supplies x
    already in bf16 so the cast below fuses with the producer instead of
    costing an extra pass over x.
    """
    B = x.shape[0]
    out_dtype = x.dtype

    x_c = x.astype(compute_dtype)
    wt = weight.astype(compute_dtype).T          # [1024, 8]
    b2 = bias.astype(jnp.float32).reshape(1, OUT_FEATURES)

    max_tile = MAX_TILE_B_BF16 if compute_dtype == jnp.bfloat16 else MAX_TILE_B_F32

    # Pick the batch tile: at least enough tiles to fit VMEM, and for medium+
    # batches force several grid steps so both v7x TensorCores participate.
    n_tiles = _cdiv(B, max_tile)
    if B >= 2 * MIN_TILE_B:
        n_tiles = max(n_tiles, min(TARGET_GRID_STEPS, B // MIN_TILE_B))
    n_tiles = max(n_tiles, 1)
    tb = _round_up(_cdiv(B, n_tiles), 8)
    if tb >= B:
        tb = B            # single full-extent block (exempt from 8-row rule)
    grid = _cdiv(B, tb)   # last block may be partial; OOB writes are masked

    bytes_per_x_elem = jnp.dtype(compute_dtype).itemsize
    cost = pl.CostEstimate(
        flops=2 * B * IN_FEATURES * OUT_FEATURES,
        bytes_accessed=(B * IN_FEATURES * bytes_per_x_elem
                        + IN_FEATURES * OUT_FEATURES * bytes_per_x_elem
                        + B * OUT_FEATURES * jnp.dtype(out_dtype).itemsize),
        transcendentals=0,
    )

    out = pl.pallas_call(
        _linear_kernel,
        out_shape=jax.ShapeDtypeStruct((B, OUT_FEATURES), out_dtype),
        grid_spec=pltpu.PrefetchScalarGridSpec(
            num_scalar_prefetch=0,
            grid=(grid,),
            in_specs=[
                pl.BlockSpec((tb, IN_FEATURES), lambda i: (i, 0)),
                pl.BlockSpec((IN_FEATURES, OUT_FEATURES), lambda i: (0, 0)),
                pl.BlockSpec((1, OUT_FEATURES), lambda i: (0, 0)),
            ],
            out_specs=pl.BlockSpec((tb, OUT_FEATURES), lambda i: (i, 0)),
        ),
        compiler_params=pltpu.CompilerParams(
            # Batch tiles are independent -> shard the grid across both v7x
            # TensorCores; harmless on v5e/v6e.
            dimension_semantics=("parallel",),
        ),
        cost_estimate=cost,
    )(x_c, wt, b2)

    return out


def _reference(x, weight, bias):
    return x @ weight.T + bias[None, :]


if __name__ == "__main__":
    key = jax.random.PRNGKey(0)
    kx, kw, kb, kx2 = jax.random.split(key, 4)

    # Deterministic synthetic parameters (shapes match nn.Linear(1024, 8)).
    weight = jax.random.normal(kw, (OUT_FEATURES, IN_FEATURES), dtype=jnp.float32) * 0.02
    bias = jax.random.normal(kb, (OUT_FEATURES,), dtype=jnp.float32) * 0.02

    # Small-batch path (single tile), f32 compute -> exact nn.Linear numerics.
    B1 = 8
    x1 = jax.random.normal(kx, (B1, IN_FEATURES), dtype=jnp.float32)
    y1 = jax.block_until_ready(
        emo_classifier_1024_forward(x1, weight, bias, compute_dtype=jnp.float32))
    y1_ref = _reference(x1, weight, bias)
    assert y1.shape == (B1, OUT_FEATURES)
    assert jnp.allclose(y1, y1_ref, atol=1e-4, rtol=1e-4), "mismatch vs reference (B=8, f32)"

    # Small-batch path, default bf16 compute (looser tolerance).
    y1b = jax.block_until_ready(emo_classifier_1024_forward(x1, weight, bias))
    assert jnp.allclose(y1b, y1_ref, atol=3e-2, rtol=3e-2), "mismatch vs reference (B=8, bf16)"

    # Ragged batch: multiple grid steps + partial last block, no full-batch pad.
    B2 = 300  # -> 2 tiles of 152 rows; last block has 148 valid rows
    x2 = jax.random.normal(kx2, (B2, IN_FEATURES), dtype=jnp.float32)
    y2 = jax.block_until_ready(emo_classifier_1024_forward(x2, weight, bias))
    y2_ref = _reference(x2, weight, bias)
    assert y2.shape == (B2, OUT_FEATURES)
    assert jnp.allclose(y2, y2_ref, atol=3e-2, rtol=3e-2), "mismatch vs reference (B=300, bf16)"

    print("KERNEL_OK")
</pallas_src>

<mosaic_0001>
module attributes {stable_mosaic.version = 11 : i64} {
  func.func @_linear_kernel(%arg0: i32, %arg1: memref<8x1024xf32, #tpu.memory_space<vmem>>, %arg2: memref<1024x8xf32, #tpu.memory_space<vmem>>, %arg3: memref<1x8xf32, #tpu.memory_space<vmem>>, %arg4: memref<8x8xf32, #tpu.memory_space<vmem>>) attributes {dimension_semantics = [#tpu.dimension_semantics<parallel>], iteration_bounds = array<i64: 1>, scalar_prefetch = 0 : i64, scratch_operands = 0 : i64, tpu.core_type = #tpu.core_type<tc>, window_params = [{transform_indices = @transform_0, window_bounds = array<i64: 8, 1024>}, {pipeline_mode = #tpu.pipeline_mode<synchronous>, transform_indices = @transform_1, window_bounds = array<i64: 1024, 8>}, {pipeline_mode = #tpu.pipeline_mode<synchronous>, transform_indices = @transform_2, window_bounds = array<i64: 1, 8>}, {transform_indices = @transform_3, window_bounds = array<i64: 8, 8>}]} {
    %c0 = arith.constant 0 : index
    %c0_0 = arith.constant 0 : index
    %0 = vector.load %arg1[%c0, %c0_0] : memref<8x1024xf32, #tpu.memory_space<vmem>>, vector<8x1024xf32>
    %c0_1 = arith.constant 0 : index
    %c0_2 = arith.constant 0 : index
    %1 = vector.load %arg2[%c0_1, %c0_2] : memref<1024x8xf32, #tpu.memory_space<vmem>>, vector<1024x8xf32>
    %cst = arith.constant dense<0.000000e+00> : vector<8x8xf32>
    %2 = tpu.matmul %0, %1, %cst {dimension_numbers = #tpu.dot_dimension_numbers<[1], [0], [0], [1], [0, 0, 1, 1], [], []>} : vector<8x1024xf32>, vector<1024x8xf32>, vector<8x8xf32> -> vector<8x8xf32>
    %c0_3 = arith.constant 0 : index
    %c0_4 = arith.constant 0 : index
    %3 = vector.load %arg3[%c0_3, %c0_4] : memref<1x8xf32, #tpu.memory_space<vmem>>, vector<1x8xf32>
    %4 = vector.broadcast %3 : vector<1x8xf32> to vector<8x8xf32>
    %5 = arith.addf %2, %4 : vector<8x8xf32>
    %c0_5 = arith.constant 0 : index
    %c0_6 = arith.constant 0 : index
    %6 = vector.load %arg4[%c0_5, %c0_6] : memref<8x8xf32, #tpu.memory_space<vmem>>, vector<8x8xf32>
    tpu.vector_store %arg4[%c0_5, %c0_6], %5 {strides = array<i32>} : memref<8x8xf32, #tpu.memory_space<vmem>>, vector<8x8xf32>,
    return
  }
  func.func @transform_0(%arg0: i32) -> (i32, i32) {
    %c0_i32 = arith.constant 0 : i32
    %c0_i32_0 = arith.constant 0 : i32
    return %arg0, %c0_i32 : i32, i32
  }
  func.func @transform_1(%arg0: i32) -> (i32, i32) {
    %c0_i32 = arith.constant 0 : i32
    %c0_i32_0 = arith.constant 0 : i32
    %c0_i32_1 = arith.constant 0 : i32
    return %c0_i32, %c0_i32_0 : i32, i32
  }
  func.func @transform_2(%arg0: i32) -> (i32, i32) {
    %c0_i32 = arith.constant 0 : i32
    %c0_i32_0 = arith.constant 0 : i32
    %c0_i32_1 = arith.constant 0 : i32
    return %c0_i32, %c0_i32_0 : i32, i32
  }
  func.func @transform_3(%arg0: i32) -> (i32, i32) {
    %c0_i32 = arith.constant 0 : i32
    %c0_i32_0 = arith.constant 0 : i32
    return %arg0, %c0_i32 : i32, i32
  }
}

</mosaic_0001>

<bundles_post_ra>
// kernel: tpu_custom_call.1
= control target key start
LH: loop header
LB: loop body
LE: loop exit
PB: predicated region body
PF: predicated region fallthrough
CT: control target
= control target key end

     0   :  { %s1053_s0 = inlined_call_operand.vmem [shape: f32[8,1024], index: 0, kind: input, shape index: {}]   ;;  %s1054_s1 = inlined_call_operand.vmem [shape: f32[1024,8], index: 1, kind: input, shape index: {}]   ;;  %s1055_s2 = inlined_call_operand.vmem [shape: f32[1,8], index: 2, kind: input, shape index: {}]   ;;  %s1056_s3 = inlined_call_operand.hbm [shape: f32[8,8], index: 3, kind: output, shape index: {}]  }
   0x1   :  { %v54_v0 = vld [vmem:[%s1054_s1 + $0xf8] sm:$0xff]  ;;  %v53_v4 = vld [vmem:[%s1054_s1 + $0xf0] sm:$0xff]  ;;  %v52_v8 = vld [vmem:[%s1054_s1 + $0xe8] sm:$0xff] }
   0x2   :  { %v86_v1 = vld [vmem:[%s1054_s1 + $0x1f8] sm:$0xff]  ;;  %455 = vmatprep.subr.mxu0 %v54_v0  ;;  %v85_v5 = vld [vmem:[%s1054_s1 + $0x1f0] sm:$0xff]  ;;  %v84_v9 = vld [vmem:[%s1054_s1 + $0x1e8] sm:$0xff] }
   0x3   :  { %v38_v2 = vld [vmem:[%s1054_s1 + $0x78] sm:$0xff]  ;;  %490 = vmatprep.subr.mxu1 %v86_v1  ;;  %v37_v6 = vld [vmem:[%s1054_s1 + $0x70] sm:$0xff]  ;;  %v36_v10 = vld [vmem:[%s1054_s1 + $0x68] sm:$0xff] }
   0x4   :  { %v70_v3 = vld [vmem:[%s1054_s1 + $0x178] sm:$0xff]  ;;  %456 = vmatpush3.msra.mxu0 %v38_v2  ;;  %v69_v7 = vld [vmem:[%s1054_s1 + $0x170] sm:$0xff]  ;;  %v68_v11 = vld [vmem:[%s1054_s1 + $0x168] sm:$0xff] }
   0x5   :  { %491 = vmatpush3.msra.mxu1 %v70_v3  ;;  %457 = vmatprep.subr.mxu0 %v53_v4  ;;  %v51_v12 = vld [vmem:[%s1054_s1 + $0xe0] sm:$0xff]  ;;  %v50_v16 = vld [vmem:[%s1054_s1 + $0xd8] sm:$0xff]  ;;  %v49_v20 = vld [vmem:[%s1054_s1 + $0xd0] sm:$0xff] }
   0x6   :  { %492 = vmatprep.subr.mxu1 %v85_v5  ;;  %458 = vmatpush3.msra.mxu0 %v37_v6  ;;  %v83_v13 = vld [vmem:[%s1054_s1 + $0x1e0] sm:$0xff]  ;;  %v82_v17 = vld [vmem:[%s1054_s1 + $0x1d8] sm:$0xff]  ;;  %v81_v21 = vld [vmem:[%s1054_s1 + $0x1d0] sm:$0xff] }
   0x7   :  { %493 = vmatpush3.msra.mxu1 %v69_v7  ;;  %459 = vmatprep.subr.mxu0 %v52_v8  ;;  %v35_v14 = vld [vmem:[%s1054_s1 + $0x60] sm:$0xff]  ;;  %v34_v18 = vld [vmem:[%s1054_s1 + $0x58] sm:$0xff]  ;;  %v33_v22 = vld [vmem:[%s1054_s1 + $0x50] sm:$0xff] }
   0x8   :  { %494 = vmatprep.subr.mxu1 %v84_v9  ;;  %v67_v15 = vld [vmem:[%s1054_s1 + $0x160] sm:$0xff]  ;;  %460 = vmatpush3.msra.mxu0 %v36_v10  ;;  %v66_v19 = vld [vmem:[%s1054_s1 + $0x158] sm:$0xff]  ;;  %v65_v23 = vld [vmem:[%s1054_s1 + $0x150] sm:$0xff] }
   0x9   :  { %495 = vmatpush3.msra.mxu1 %v68_v11  ;;  %461 = vmatprep.subr.mxu0 %v51_v12  ;;  %v48_v24 = vld [vmem:[%s1054_s1 + $0xc8] sm:$0xff]  ;;  %v47_v28 = vld [vmem:[%s1054_s1 + $0xc0] sm:$0xff]  ;;  %v46_v32 = vld [vmem:[%s1054_s1 + $0xb8] sm:$0xff] }
   0xa   :  { %496 = vmatprep.subr.mxu1 %v83_v13  ;;  %462 = vmatpush3.msra.mxu0 %v35_v14  ;;  %v80_v25 = vld [vmem:[%s1054_s1 + $0x1c8] sm:$0xff]  ;;  %v79_v29 = vld [vmem:[%s1054_s1 + $0x1c0] sm:$0xff]  ;;  %v78_v33 = vld [vmem:[%s1054_s1 + $0x1b8] sm:$0xff] }
   0xb   :  { %497 = vmatpush3.msra.mxu1 %v67_v15  ;;  %463 = vmatprep.subr.mxu0 %v50_v16  ;;  %v32_v26 = vld [vmem:[%s1054_s1 + $0x48] sm:$0xff]  ;;  %v31_v30 = vld [vmem:[%s1054_s1 + $0x40] sm:$0xff]  ;;  %v30_v34 = vld [vmem:[%s1054_s1 + $0x38] sm:$0xff] }
   0xc   :  { %498 = vmatprep.subr.mxu1 %v82_v17  ;;  %464 = vmatpush3.msra.mxu0 %v34_v18  ;;  %v64_v27 = vld [vmem:[%s1054_s1 + $0x148] sm:$0xff]  ;;  %v63_v31 = vld [vmem:[%s1054_s1 + $0x140] sm:$0xff]  ;;  %v62_v35 = vld [vmem:[%s1054_s1 + $0x138] sm:$0xff] }
   0xd   :  { %499 = vmatpush3.msra.mxu1 %v66_v19  ;;  %465 = vmatprep.subr.mxu0 %v49_v20  ;;  %v45_v36 = vld [vmem:[%s1054_s1 + $0xb0] sm:$0xff]  ;;  %v44_v40 = vld [vmem:[%s1054_s1 + $0xa8] sm:$0xff]  ;;  %v43_v44 = vld [vmem:[%s1054_s1 + $0xa0] sm:$0xff] }
   0xe   :  { %500 = vmatprep.subr.mxu1 %v81_v21  ;;  %466 = vmatpush3.msra.mxu0 %v33_v22  ;;  %v77_v37 = vld [vmem:[%s1054_s1 + $0x1b0] sm:$0xff]  ;;  %v76_v41 = vld [vmem:[%s1054_s1 + $0x1a8] sm:$0xff]  ;;  %v75_v45 = vld [vmem:[%s1054_s1 + $0x1a0] sm:$0xff] }
   0xf   :  { %501 = vmatpush3.msra.mxu1 %v65_v23  ;;  %467 = vmatprep.subr.mxu0 %v48_v24  ;;  %v29_v38 = vld [vmem:[%s1054_s1 + $0x30] sm:$0xff]  ;;  %v28_v42 = vld [vmem:[%s1054_s1 + $0x28] sm:$0xff]  ;;  %v27_v46 = vld [vmem:[%s1054_s1 + $0x20] sm:$0xff] }
  0x10   :  { %502 = vmatprep.subr.mxu1 %v80_v25  ;;  %468 = vmatpush3.msra.mxu0 %v32_v26  ;;  %v61_v39 = vld [vmem:[%s1054_s1 + $0x130] sm:$0xff]  ;;  %v60_v43 = vld [vmem:[%s1054_s1 + $0x128] sm:$0xff]  ;;  %v59_v47 = vld [vmem:[%s1054_s1 + $0x120] sm:$0xff] }
  0x11   :  { %503 = vmatpush3.msra.mxu1 %v64_v27  ;;  %469 = vmatprep.subr.mxu0 %v47_v28  ;;  %v42_v48 = vld [vmem:[%s1054_s1 + $0x98] sm:$0xff]  ;;  %v41_v52 = vld [vmem:[%s1054_s1 + $0x90] sm:$0xff]  ;;  %v40_v56 = vld [vmem:[%s1054_s1 + $0x88] sm:$0xff] }
  0x12   :  { %504 = vmatprep.subr.mxu1 %v79_v29  ;;  %470 = vmatpush3.msra.mxu0 %v31_v30  ;;  %v74_v49 = vld [vmem:[%s1054_s1 + $0x198] sm:$0xff]  ;;  %v73_v53 = vld [vmem:[%s1054_s1 + $0x190] sm:$0xff]  ;;  %v72_v57 = vld [vmem:[%s1054_s1 + $0x188] sm:$0xff] }
  0x13   :  { %505 = vmatpush3.msra.mxu1 %v63_v31  ;;  %471 = vmatprep.subr.mxu0 %v46_v32  ;;  %v26_v50 = vld [vmem:[%s1054_s1 + $0x18] sm:$0xff]  ;;  %v25_v54 = vld [vmem:[%s1054_s1 + $0x10] sm:$0xff]  ;;  %v24_v58 = vld [vmem:[%s1054_s1 + $0x8] sm:$0xff] }
  0x14   :  { %506 = vmatprep.subr.mxu1 %v78_v33  ;;  %472 = vmatpush3.msra.mxu0 %v30_v34  ;;  %v58_v51 = vld [vmem:[%s1054_s1 + $0x118] sm:$0xff]  ;;  %v57_v55 = vld [vmem:[%s1054_s1 + $0x110] sm:$0xff]  ;;  %v56_v59 = vld [vmem:[%s1054_s1 + $0x108] sm:$0xff] }
  0x15   :  { %507 = vmatpush3.msra.mxu1 %v62_v35  ;;  %473 = vmatprep.subr.mxu0 %v45_v36  ;;  %v39_v60 = vld [vmem:[%s1054_s1 + $0x80] sm:$0xff]  ;;  %v16_v63 = vld [vmem:[%s1053_s0 + $0x8] sm:$0xff]  ;;  %v18_v2 = vld [vmem:[%s1053_s0 + $0x18] sm:$0xff] }
  0x16   :  { %508 = vmatprep.subr.mxu1 %v77_v37  ;;  %474 = vmatpush3.msra.mxu0 %v29_v38  ;;  %v71_v61 = vld [vmem:[%s1054_s1 + $0x180] sm:$0xff]  ;;  %v118_v3 = vld [vmem:[%s1054_s1 + $0x2f8] sm:$0xff]  ;;  %v17_v5 = vld [vmem:[%s1053_s0 + $0x10] sm:$0xff] }
  0x17   :  { %509 = vmatpush3.msra.mxu1 %v61_v39  ;;  %475 = vmatprep.subr.mxu0 %v44_v40  ;;  %v23_v62 = vld [vmem:[%s1054_s1] sm:$0xff]  ;;  %v150_v4 = vld [vmem:[%s1054_s1 + $0x3f8] sm:$0xff]  ;;  %v117_v8 = vld [vmem:[%s1054_s1 + $0x2f0] sm:$0xff] }
  0x18   :  { %510 = vmatprep.subr.mxu1 %v76_v41  ;;  %476 = vmatpush3.msra.mxu0 %v28_v42  ;;  %v55_v0 = vld [vmem:[%s1054_s1 + $0x100] sm:$0xff]  ;;  %v102_v6 = vld [vmem:[%s1054_s1 + $0x278] sm:$0xff]  ;;  %v149_v9 = vld [vmem:[%s1054_s1 + $0x3f0] sm:$0xff] }
  0x19   :  { %511 = vmatpush3.msra.mxu1 %v60_v43  ;;  %477 = vmatprep.subr.mxu0 %v43_v44  ;;  %v15_v1 = vld [vmem:[%s1053_s0] sm:$0xff]  ;;  %v134_v7 = vld [vmem:[%s1054_s1 + $0x378] sm:$0xff]  ;;  %v101_v10 = vld [vmem:[%s1054_s1 + $0x270] sm:$0xff] }
  0x1a   :  { %512 = vmatprep.subr.mxu1 %v75_v45  ;;  %478 = vmatpush3.msra.mxu0 %v27_v46  ;;  %v133_v11 = vld [vmem:[%s1054_s1 + $0x370] sm:$0xff]  ;;  %v116_v12 = vld [vmem:[%s1054_s1 + $0x2e8] sm:$0xff]  ;;  %v115_v16 = vld [vmem:[%s1054_s1 + $0x2e0] sm:$0xff] }
  0x1b   :  { %513 = vmatpush3.msra.mxu1 %v59_v47  ;;  %479 = vmatprep.subr.mxu0 %v42_v48  ;;  %v148_v13 = vld [vmem:[%s1054_s1 + $0x3e8] sm:$0xff]  ;;  %v147_v17 = vld [vmem:[%s1054_s1 + $0x3e0] sm:$0xff]  ;;  %v114_v20 = vld [vmem:[%s1054_s1 + $0x2d8] sm:$0xff] }
  0x1c   :  { %514 = vmatprep.subr.mxu1 %v74_v49  ;;  %480 = vmatpush3.msra.mxu0 %v26_v50  ;;  %v100_v14 = vld [vmem:[%s1054_s1 + $0x268] sm:$0xff]  ;;  %v99_v18 = vld [vmem:[%s1054_s1 + $0x260] sm:$0xff]  ;;  %v146_v21 = vld [vmem:[%s1054_s1 + $0x3d8] sm:$0xff] }
  0x1d   :  { %515 = vmatpush3.msra.mxu1 %v58_v51  ;;  %481 = vmatprep.subr.mxu0 %v41_v52  ;;  %v132_v15 = vld [vmem:[%s1054_s1 + $0x368] sm:$0xff]  ;;  %v131_v19 = vld [vmem:[%s1054_s1 + $0x360] sm:$0xff]  ;;  %v98_v22 = vld [vmem:[%s1054_s1 + $0x258] sm:$0xff] }
  0x1e   :  { %516 = vmatprep.subr.mxu1 %v73_v53  ;;  %482 = vmatpush3.msra.mxu0 %v25_v54  ;;  %v130_v23 = vld [vmem:[%s1054_s1 + $0x358] sm:$0xff]  ;;  %v113_v24 = vld [vmem:[%s1054_s1 + $0x2d0] sm:$0xff]  ;;  %v112_v28 = vld [vmem:[%s1054_s1 + $0x2c8] sm:$0xff] }
  0x1f   :  { %517 = vmatpush3.msra.mxu1 %v57_v55  ;;  %483 = vmatprep.subr.mxu0 %v40_v56  ;;  %v145_v25 = vld [vmem:[%s1054_s1 + $0x3d0] sm:$0xff]  ;;  %v144_v29 = vld [vmem:[%s1054_s1 + $0x3c8] sm:$0xff] }
  0x20   :  { %518 = vmatprep.subr.mxu1 %v72_v57  ;;  %484 = vmatpush3.msra.mxu0 %v24_v58  ;;  %v97_v26 = vld [vmem:[%s1054_s1 + $0x250] sm:$0xff]  ;;  %v96_v30 = vld [vmem:[%s1054_s1 + $0x248] sm:$0xff] }
  0x21   :  { %519 = vmatpush3.msra.mxu1 %v56_v59  ;;  %485 = vmatprep.subr.mxu0 %v39_v60  ;;  %v129_v27 = vld [vmem:[%s1054_s1 + $0x350] sm:$0xff]  ;;  %v128_v31 = vld [vmem:[%s1054_s1 + $0x348] sm:$0xff] }
  0x22   :  { %520 = vmatprep.subr.mxu1 %v71_v61  ;;  %486 = vmatpush3.msra.mxu0 %v23_v62 }
  0x23   :  { %222 = vmatprep.mubr.f32.mxu0 %v16_v63  ;;  %521 = vmatpush3.msra.mxu1 %v55_v0 }
  0x24   :  { %223 = vmatmul.mubr.f32.vlgmr.msra.gmra.mxu0 %v15_v1  ;;  %292 = vmatprep.mubr.f32.mxu1 %v18_v2 }
  0x25   :  { %525 = vmatprep.subr.mxu0 %v118_v3  ;;  %560 = vmatprep.subr.mxu1 %v150_v4 }
  0x26   :  { %293 = vmatmul.mubr.f32.vlgmr.msra.gmra.mxu1 %v17_v5  ;;  %526 = vmatpush3.msra.mxu0 %v102_v6 }
  0x27   :  { %561 = vmatpush3.msra.mxu1 %v134_v7  ;;  %527 = vmatprep.subr.mxu0 %v117_v8 }
  0x28   :  { %562 = vmatprep.subr.mxu1 %v149_v9  ;;  %528 = vmatpush3.msra.mxu0 %v101_v10 }
  0x29   :  { %563 = vmatpush3.msra.mxu1 %v133_v11  ;;  %529 = vmatprep.subr.mxu0 %v116_v12 }
  0x2a   :  { %564 = vmatprep.subr.mxu1 %v148_v13  ;;  %530 = vmatpush3.msra.mxu0 %v100_v14 }
  0x2b   :  { %565 = vmatpush3.msra.mxu1 %v132_v15  ;;  %531 = vmatprep.subr.mxu0 %v115_v16 }
  0x2c   :  { %566 = vmatprep.subr.mxu1 %v147_v17  ;;  %532 = vmatpush3.msra.mxu0 %v99_v18 }
  0x2d   :  { %567 = vmatpush3.msra.mxu1 %v131_v19  ;;  %533 = vmatprep.subr.mxu0 %v114_v20 }
  0x2e   :  { %568 = vmatprep.subr.mxu1 %v146_v21  ;;  %534 = vmatpush3.msra.mxu0 %v98_v22 }
  0x2f   :  { %569 = vmatpush3.msra.mxu1 %v130_v23  ;;  %535 = vmatprep.subr.mxu0 %v113_v24 }
  0x30   :  { %570 = vmatprep.subr.mxu1 %v145_v25 }
  0x31   :  { %8 = vsyncpa [#allocation3], 0  ;;  %536 = vmatpush3.msra.mxu0 %v97_v26  ;;  %571 = vmatpush3.msra.mxu1 %v129_v27  ;;  %v111_v32 = vld [vmem:[%s1054_s1 + $0x2c0] sm:$0xff]  ;;  %v110_v36 = vld [vmem:[%s1054_s1 + $0x2b8] sm:$0xff]  ;;  %vm438_vm0 = vcmask 64512  }
  0x32   :  { %v143_v33 = vld [vmem:[%s1054_s1 + $0x3c0] sm:$0xff]  ;;  %537 = vmatprep.subr.mxu0 %v112_v28  ;;  %572 = vmatprep.subr.mxu1 %v144_v29  ;;  %v142_v37 = vld [vmem:[%s1054_s1 + $0x3b8] sm:$0xff]  ;;  %v109_v40 = vld [vmem:[%s1054_s1 + $0x2b0] sm:$0xff] }
  0x33   :  { %v95_v34 = vld [vmem:[%s1054_s1 + $0x240] sm:$0xff]  ;;  %538 = vmatpush3.msra.mxu0 %v96_v30  ;;  %573 = vmatpush3.msra.mxu1 %v128_v31  ;;  %v94_v38 = vld [vmem:[%s1054_s1 + $0x238] sm:$0xff]  ;;  %v141_v41 = vld [vmem:[%s1054_s1 + $0x3b0] sm:$0xff] }
  0x34   :  { %v127_v35 = vld [vmem:[%s1054_s1 + $0x340] sm:$0xff]  ;;  %539 = vmatprep.subr.mxu0 %v111_v32  ;;  %574 = vmatprep.subr.mxu1 %v143_v33  ;;  %v126_v39 = vld [vmem:[%s1054_s1 + $0x338] sm:$0xff]  ;;  %v93_v42 = vld [vmem:[%s1054_s1 + $0x230] sm:$0xff] }
  0x35   :  { %540 = vmatpush3.msra.mxu0 %v95_v34  ;;  %575 = vmatpush3.msra.mxu1 %v127_v35  ;;  %v125_v43 = vld [vmem:[%s1054_s1 + $0x330] sm:$0xff]  ;;  %v108_v44 = vld [vmem:[%s1054_s1 + $0x2a8] sm:$0xff]  ;;  %v107_v48 = vld [vmem:[%s1054_s1 + $0x2a0] sm:$0xff] }
  0x36   :  { %541 = vmatprep.subr.mxu0 %v110_v36  ;;  %576 = vmatprep.subr.mxu1 %v142_v37  ;;  %v140_v45 = vld [vmem:[%s1054_s1 + $0x3a8] sm:$0xff]  ;;  %v139_v49 = vld [vmem:[%s1054_s1 + $0x3a0] sm:$0xff]  ;;  %v106_v52 = vld [vmem:[%s1054_s1 + $0x298] sm:$0xff] }
  0x37   :  { %542 = vmatpush3.msra.mxu0 %v94_v38  ;;  %577 = vmatpush3.msra.mxu1 %v126_v39  ;;  %v92_v46 = vld [vmem:[%s1054_s1 + $0x228] sm:$0xff]  ;;  %v91_v50 = vld [vmem:[%s1054_s1 + $0x220] sm:$0xff]  ;;  %v138_v53 = vld [vmem:[%s1054_s1 + $0x398] sm:$0xff] }
  0x38   :  { %543 = vmatprep.subr.mxu0 %v109_v40  ;;  %578 = vmatprep.subr.mxu1 %v141_v41  ;;  %v124_v47 = vld [vmem:[%s1054_s1 + $0x328] sm:$0xff]  ;;  %v123_v51 = vld [vmem:[%s1054_s1 + $0x320] sm:$0xff]  ;;  %v90_v54 = vld [vmem:[%s1054_s1 + $0x218] sm:$0xff] }
  0x39   :  { %544 = vmatpush3.msra.mxu0 %v93_v42  ;;  %579 = vmatpush3.msra.mxu1 %v125_v43  ;;  %v122_v55 = vld [vmem:[%s1054_s1 + $0x318] sm:$0xff]  ;;  %v105_v56 = vld [vmem:[%s1054_s1 + $0x290] sm:$0xff]  ;;  %v104_v60 = vld [vmem:[%s1054_s1 + $0x288] sm:$0xff] }
  0x3a   :  { %545 = vmatprep.subr.mxu0 %v108_v44  ;;  %580 = vmatprep.subr.mxu1 %v140_v45  ;;  %v137_v57 = vld [vmem:[%s1054_s1 + $0x390] sm:$0xff]  ;;  %v136_v61 = vld [vmem:[%s1054_s1 + $0x388] sm:$0xff]  ;;  %v103_v0 = vld [vmem:[%s1054_s1 + $0x280] sm:$0xff] }
  0x3b   :  { %546 = vmatpush3.msra.mxu0 %v92_v46  ;;  %581 = vmatpush3.msra.mxu1 %v124_v47  ;;  %v89_v58 = vld [vmem:[%s1054_s1 + $0x210] sm:$0xff]  ;;  %v88_v62 = vld [vmem:[%s1054_s1 + $0x208] sm:$0xff]  ;;  %v135_v1 = vld [vmem:[%s1054_s1 + $0x380] sm:$0xff] }
  0x3c   :  { %547 = vmatprep.subr.mxu0 %v107_v48  ;;  %582 = vmatprep.subr.mxu1 %v139_v49  ;;  %v121_v59 = vld [vmem:[%s1054_s1 + $0x310] sm:$0xff]  ;;  %v120_v63 = vld [vmem:[%s1054_s1 + $0x308] sm:$0xff]  ;;  %v87_v2 = vld [vmem:[%s1054_s1 + $0x200] sm:$0xff] }
  0x3d   :  { %548 = vmatpush3.msra.mxu0 %v91_v50  ;;  %583 = vmatpush3.msra.mxu1 %v123_v51  ;;  %v20_v3 = vld [vmem:[%s1053_s0 + $0x28] sm:$0xff]  ;;  %v119_v4 = vld [vmem:[%s1054_s1 + $0x300] sm:$0xff]  ;;  %v22_v5 = vld [vmem:[%s1053_s0 + $0x38] sm:$0xff] }
  0x3e   :  { %549 = vmatprep.subr.mxu0 %v106_v52  ;;  %584 = vmatprep.subr.mxu1 %v138_v53  ;;  %v19_v6 = vld [vmem:[%s1053_s0 + $0x20] sm:$0xff]  ;;  %v21_v7 = vld [vmem:[%s1053_s0 + $0x30] sm:$0xff]  ;;  %s618_s0 = smov [#allocation2]  }
  0x3f   :  { %550 = vmatpush3.msra.mxu0 %v90_v54  ;;  %585 = vmatpush3.msra.mxu1 %v122_v55  ;;  %v454_v12 = vld [vmem:[%s1055_s2] ss:$0 sm:$0xff]  ;;  %s446_s15 = sshll.u32 %s618_s0, 4  ;;  %s447_s15 = int_to_ptr.vmem [resolvable:$true] %s446_s15 }
  0x40   :  { %551 = vmatprep.subr.mxu0 %v105_v56  ;;  %586 = vmatprep.subr.mxu1 %v137_v57  ;;  %s596_s16 = scalar_lea.vmem %s447_s15, 128  ;;  %p601_p1 = scmp.lt.s32.totalorder %s447_s15, %s447_s15 }
  0x41   :  { %552 = vmatpush3.msra.mxu0 %v89_v58  ;;  %587 = vmatpush3.msra.mxu1 %v121_v59  ;;  %p597_p0 = scmp.ne.s32.totalorder %s447_s15, %s596_s16  ;;  %p602_p2 = scmp.lt.s32.totalorder %s596_s16, %s596_s16 }
  0x42   :  { %553 = vmatprep.subr.mxu0 %v104_v60  ;;  %588 = vmatprep.subr.mxu1 %v136_v61 }
  0x43   :  { %554 = vmatpush3.msra.mxu0 %v88_v62  ;;  %589 = vmatpush3.msra.mxu1 %v120_v63  ;;  %p603_p3 = por %p602_p2, %p601_p1 }
  0x44   :  { %555 = vmatprep.subr.mxu0 %v103_v0  ;;  %590 = vmatprep.subr.mxu1 %v135_v1 }
  0x45   :  { %556 = vmatpush3.msra.mxu0 %v87_v2  ;;  %362 = vmatprep.mubr.f32.mxu0 %v20_v3  ;;  %p604_p4 = pnand %p603_p3, %p597_p0 }
  0x46   :  { %591 = vmatpush3.msra.mxu1 %v119_v4  ;;  %432 = vmatprep.mubr.f32.mxu1 %v22_v5 }
  0x47   :  { %363 = vmatmul.mubr.f32.vlgmr.msra.gmra.mxu0 %v19_v6  ;;  %433 = vmatmul.mubr.f32.vlgmr.msra.gmra.mxu1 %v21_v7 }
  0xe4   :  { %v487_v8 = vpop.f32.mrf.mxu0 }
  0xe6   :  { %v522_v9 = vpop.f32.mrf.mxu1  ;;  %v488_v10 = vpop.f32.mrf.mxu0 }
  0xe7   :  { %v489_v11 = vadd.f32 %v488_v10, %v487_v8 }
  0xe8   :  { %v523_v13 = vpop.f32.mrf.mxu1 }
  0xe9   :  { %v225_v14 = vadd.f32 %v489_v11, %v454_v12  ;;  %v524_v15 = vadd.f32 %v523_v13, %v522_v9 }
  0xeb   :  { %v295_v20 = vadd.f32 %v524_v15, %v225_v14 }
 0x107   :  { %v557_v16 = vpop.f32.mrf.mxu0  ;;  %v592_v17 = vpop.f32.mrf.mxu1 }
 0x109   :  { %v558_v18 = vpop.f32.mrf.mxu0  ;;  %v593_v19 = vpop.f32.mrf.mxu1 }
 0x10a   :  { %v559_v21 = vadd.f32 %v558_v18, %v557_v16  ;;  %v594_v23 = vadd.f32 %v593_v19, %v592_v17 }
 0x10c   :  { %v365_v22 = vadd.f32 %v559_v21, %v295_v20 }
 0x10e   :  { %v435_v24 = vadd.f32 %v594_v23, %v365_v22 }
 0x110   :  { %439 = vst.msk [vmem:[#allocation2] sm:$0xff] %vm438_vm0, %v435_v24 }
 0x111   :  { %607 = shalt.err (!%p604_p4)
}
 0x112   :  { %449 = dma.vmem_to_hbm [thread:$0]  %s447_s15, 128, %s1056_s3, [#allocation3]  }
 0x113   :  { %616 = dma.done.wait [#allocation3], 128  }
 0x114   :  { %617 = vsyncadd [#allocation3], 4294967168 }
 0x115   :  { %453 = vsyncpa [#allocation3], 1 }

</bundles_post_ra>
